<compile_context>
chip_gen: v7x
topology: tpu7x:2x2x1
jax: 0.10.0
libtpu: 0.0.40
codegen_flags: <defaults>
</compile_context>

<pallas_src>
import functools

import jax
import jax.numpy as jnp
from jax.experimental import pallas as pl
from jax.experimental.pallas import tpu as pltpu


def _round_up(x, m):
    return ((x + m - 1) // m) * m


def _mlp_kernel(x_ref, w1_ref, b1_ref, w2_ref, b2_ref, w3_ref, b3_ref, o_ref):
    # In-kernel bf16 cast of the streamed x tile (saves a standalone HBM cast pass).
    x = x_ref[...].astype(jnp.bfloat16)
    # Layer 1: Linear + ReLU  (bf16 operands on the MXU, f32 accumulation/epilogue)
    h = jnp.dot(x, w1_ref[...], preferred_element_type=jnp.float32)
    h = jnp.maximum(h + b1_ref[...], 0.0)
    # Layer 2: Linear + ReLU
    h = jnp.dot(h.astype(jnp.bfloat16), w2_ref[...], preferred_element_type=jnp.float32)
    h = jnp.maximum(h + b2_ref[...], 0.0)
    # Output layer: Linear (no activation, norm='none'). w3 keeps its real (narrow)
    # column count so only the real out_dim columns are computed and stored.
    o = jnp.dot(h.astype(jnp.bfloat16), w3_ref[...], preferred_element_type=jnp.float32)
    o_ref[...] = (o + b3_ref[...]).astype(o_ref.dtype)


def _pad2(a, rows, cols, dtype):
    """Zero-pad a 2-D array to (rows, cols) and cast."""
    out = jnp.zeros((rows, cols), dtype)
    return out.at[: a.shape[0], : a.shape[1]].set(a.astype(dtype))


def _pad_params(params):
    """Pad hidden widths to multiples of 128 (lane-dense MXU operands) and cast
    weights to bf16 (biases stay f32 for the f32 epilogue). Output width is NOT
    padded — the kernel writes only the real columns. Exact w.r.t. the unpadded
    network: padded hidden units are relu(0)=0 and hit zero rows of the next
    weight matrix."""
    w1, b1, w2, b2, w3, b3 = params
    k = w1.shape[0]
    h0, h1, o = w1.shape[1], w2.shape[1], w3.shape[1]
    h0p, h1p = _round_up(h0, 128), _round_up(h1, 128)
    w1p = _pad2(w1, k, h0p, jnp.bfloat16)
    w2p = _pad2(w2, h0p, h1p, jnp.bfloat16)
    w3p = _pad2(w3, h1p, o, jnp.bfloat16)      # rows padded (contraction), cols real
    b1p = _pad2(b1, 1, h0p, jnp.float32)
    b2p = _pad2(b2, 1, h1p, jnp.float32)
    b3p = b3.astype(jnp.float32)               # (1, out_dim), unpadded
    return w1p, b1p, w2p, b2p, w3p, b3p


@functools.partial(jax.jit, static_argnames=("tile_b", "use_pallas"))
def mlp_estimator_forward(inp, params, *, tile_b=8192, use_pallas=True):
    """MLPEstimator.forward: inp (B, T, D) -> (B, output_dim) float32."""
    B = inp.shape[0]
    x = inp.reshape(B, -1)  # torch.flatten(inp, start_dim=1) — free metadata reshape
    k = x.shape[1]
    w1, b1, w2, b2, w3, b3 = params
    out_dim = w3.shape[1]

    if not use_pallas:
        # XLA-fused fallback — preferred for degenerate/tiny batches where the
        # fixed pallas_call + DMA setup overhead dominates.
        h = jnp.maximum(x @ w1 + b1, 0.0)
        h = jnp.maximum(h @ w2 + b2, 0.0)
        return h @ w3 + b3

    w1p, b1p, w2p, b2p, w3p, b3p = _pad_params(params)
    h0p, h1p = w1p.shape[1], w2p.shape[1]

    # Batch tiling: cap the tile at ~half the batch (rounded to 16) so the
    # "parallel" grid has >=2 balanced steps and both v7x TensorCores get work
    # for mid-size batches; the ragged last block is handled by Pallas (reads of
    # out-of-bounds rows are don't-care, their writeback is masked), so no
    # explicit batch-pad copy is needed.
    half_b = _round_up(max((B + 1) // 2, 16), 16)
    tb = min(tile_b, half_b)
    n_tiles = -(-B // tb)

    const = lambda shape: pl.BlockSpec(shape, lambda i: (0, 0))  # VMEM-resident operand

    flops = 2 * B * (k * h0p + h0p * h1p + h1p * out_dim)
    bytes_accessed = (
        B * k * 4                                   # x read (f32)
        + B * out_dim * 4                           # output write (f32)
        + (w1p.size + w2p.size + w3p.size) * 2      # bf16 weights (loaded once)
        + (b1p.size + b2p.size + b3p.size) * 4      # f32 biases
    )

    out = pl.pallas_call(
        _mlp_kernel,
        out_shape=jax.ShapeDtypeStruct((B, out_dim), jnp.float32),
        grid=(n_tiles,),
        in_specs=[
            pl.BlockSpec((tb, k), lambda i: (i, 0)),  # streamed, double-buffered x tile (f32)
            const(w1p.shape), const(b1p.shape),        # weights/biases: constant index map
            const(w2p.shape), const(b2p.shape),        #   -> loaded once, stay VMEM-resident
            const(w3p.shape), const(b3p.shape),
        ],
        out_specs=pl.BlockSpec((tb, out_dim), lambda i: (i, 0)),  # narrow (real) output
        compiler_params=pltpu.CompilerParams(dimension_semantics=("parallel",)),
        cost_estimate=pl.CostEstimate(
            flops=flops, transcendentals=0, bytes_accessed=bytes_accessed),
    )(x, w1p, b1p, w2p, b2p, w3p, b3p)

    return out


def init_params(key, in_features, hidden_nodes, out_features):
    """Deterministic synthetic params matching torch Linear init. Weights are stored
    (in, out); biases (1, out). All f32 (kernel handles bf16 cast + padding)."""
    dims = [in_features] + list(hidden_nodes) + [out_features]
    params = []
    for i in range(len(dims) - 1):
        key, kw, kb = jax.random.split(key, 3)
        bound = 1.0 / jnp.sqrt(dims[i])
        w = jax.random.uniform(kw, (dims[i], dims[i + 1]), jnp.float32, -bound, bound)
        b = jax.random.uniform(kb, (1, dims[i + 1]), jnp.float32, -bound, bound)
        params += [w, b]
    return tuple(params)


def _reference(inp, params):
    """Plain f32 JAX reference (original PyTorch forward semantics)."""
    w1, b1, w2, b2, w3, b3 = params
    x = inp.reshape(inp.shape[0], -1)
    h = jnp.maximum(x @ w1 + b1, 0.0)
    h = jnp.maximum(h @ w2 + b2, 0.0)
    return h @ w3 + b3


if __name__ == "__main__":
    # Shapes consistent with MLPEstimator: input_dim D=3 ('all' signals),
    # input_width T=8, hidden_nodes=[32, 32], output_dim=2.
    T, D = 8, 3
    hidden_nodes = [32, 32]
    output_dim = 2

    key = jax.random.PRNGKey(0)
    key, k_small, k_big = jax.random.split(key, 3)
    params = init_params(key, T * D, hidden_nodes, output_dim)

    # Small-batch check (B=2) — force the Pallas path so the kernel is exercised
    # (single ragged block: 2 real rows inside a 16-row tile, masked writeback).
    inp_small = jax.random.normal(k_small, (2, T, D), dtype=jnp.float32)
    out_small = jax.block_until_ready(
        mlp_estimator_forward(inp_small, params, use_pallas=True)
    )
    ref_small = _reference(inp_small, params)
    assert out_small.shape == (2, output_dim)
    # bf16 inputs/weights with f32 accumulation -> loosened tolerance vs f32 ref.
    assert jnp.allclose(out_small, ref_small, atol=2e-2, rtol=2e-2)

    # Larger, non-tile-aligned batch to exercise the multi-step parallel grid and
    # the ragged final block (300 = 2*128 + 44 at tile_b=128).
    B_big = 300
    inp_big = jax.random.normal(k_big, (B_big, T, D), dtype=jnp.float32)
    out_big = jax.block_until_ready(
        mlp_estimator_forward(inp_big, params, tile_b=128, use_pallas=True)
    )
    ref_big = _reference(inp_big, params)
    assert out_big.shape == (B_big, output_dim)
    assert jnp.allclose(out_big, ref_big, atol=2e-2, rtol=2e-2)

    # TODO(synk): training utilities of Estimator (calc_loss/train_model/post_process,
    # Adam optimizer, plotting) are host-side/training code, not part of forward.
    print("KERNEL_OK")
</pallas_src>

<mosaic_0001>
module attributes {stable_mosaic.version = 11 : i64} {
  func.func @_mlp_kernel(%arg0: i32, %arg1: memref<16x24xf32, #tpu.memory_space<vmem>>, %arg2: memref<24x128xbf16, #tpu.memory_space<vmem>>, %arg3: memref<1x128xf32, #tpu.memory_space<vmem>>, %arg4: memref<128x128xbf16, #tpu.memory_space<vmem>>, %arg5: memref<1x128xf32, #tpu.memory_space<vmem>>, %arg6: memref<128x2xbf16, #tpu.memory_space<vmem>>, %arg7: memref<1x2xf32, #tpu.memory_space<vmem>>, %arg8: memref<16x2xf32, #tpu.memory_space<vmem>>) attributes {dimension_semantics = [#tpu.dimension_semantics<parallel>], iteration_bounds = array<i64: 1>, scalar_prefetch = 0 : i64, scratch_operands = 0 : i64, tpu.core_type = #tpu.core_type<tc>, window_params = [{transform_indices = @transform_0, window_bounds = array<i64: 16, 24>}, {pipeline_mode = #tpu.pipeline_mode<synchronous>, transform_indices = @transform_1, window_bounds = array<i64: 24, 128>}, {pipeline_mode = #tpu.pipeline_mode<synchronous>, transform_indices = @transform_2, window_bounds = array<i64: 1, 128>}, {pipeline_mode = #tpu.pipeline_mode<synchronous>, transform_indices = @transform_3, window_bounds = array<i64: 128, 128>}, {pipeline_mode = #tpu.pipeline_mode<synchronous>, transform_indices = @transform_4, window_bounds = array<i64: 1, 128>}, {pipeline_mode = #tpu.pipeline_mode<synchronous>, transform_indices = @transform_5, window_bounds = array<i64: 128, 2>}, {pipeline_mode = #tpu.pipeline_mode<synchronous>, transform_indices = @transform_6, window_bounds = array<i64: 1, 2>}, {transform_indices = @transform_7, window_bounds = array<i64: 16, 2>}]} {
    %c0 = arith.constant 0 : index
    %c0_0 = arith.constant 0 : index
    %0 = vector.load %arg1[%c0, %c0_0] : memref<16x24xf32, #tpu.memory_space<vmem>>, vector<16x24xf32>
    %1 = arith.truncf %0 : vector<16x24xf32> to vector<16x24xbf16>
    %c0_1 = arith.constant 0 : index
    %c0_2 = arith.constant 0 : index
    %2 = vector.load %arg2[%c0_1, %c0_2] : memref<24x128xbf16, #tpu.memory_space<vmem>>, vector<24x128xbf16>
    %cst = arith.constant dense<0.000000e+00> : vector<16x128xf32>
    %3 = tpu.matmul %1, %2, %cst {dimension_numbers = #tpu.dot_dimension_numbers<[1], [0], [0], [1], [0, 0, 1, 1], [], []>} : vector<16x24xbf16>, vector<24x128xbf16>, vector<16x128xf32> -> vector<16x128xf32>
    %c0_3 = arith.constant 0 : index
    %c0_4 = arith.constant 0 : index
    %4 = vector.load %arg3[%c0_3, %c0_4] : memref<1x128xf32, #tpu.memory_space<vmem>>, vector<1x128xf32>
    %5 = vector.broadcast %4 : vector<1x128xf32> to vector<16x128xf32>
    %6 = arith.addf %3, %5 : vector<16x128xf32>
    %cst_5 = arith.constant 0.000000e+00 : f32
    %7 = vector.broadcast %cst_5 : f32 to vector<16x128xf32>
    %8 = arith.maximumf %6, %7 : vector<16x128xf32>
    %9 = arith.truncf %8 : vector<16x128xf32> to vector<16x128xbf16>
    %c0_6 = arith.constant 0 : index
    %c0_7 = arith.constant 0 : index
    %10 = vector.load %arg4[%c0_6, %c0_7] : memref<128x128xbf16, #tpu.memory_space<vmem>>, vector<128x128xbf16>
    %cst_8 = arith.constant dense<0.000000e+00> : vector<16x128xf32>
    %11 = tpu.matmul %9, %10, %cst_8 {dimension_numbers = #tpu.dot_dimension_numbers<[1], [0], [0], [1], [0, 0, 1, 1], [], []>} : vector<16x128xbf16>, vector<128x128xbf16>, vector<16x128xf32> -> vector<16x128xf32>
    %c0_9 = arith.constant 0 : index
    %c0_10 = arith.constant 0 : index
    %12 = vector.load %arg5[%c0_9, %c0_10] : memref<1x128xf32, #tpu.memory_space<vmem>>, vector<1x128xf32>
    %13 = vector.broadcast %12 : vector<1x128xf32> to vector<16x128xf32>
    %14 = arith.addf %11, %13 : vector<16x128xf32>
    %cst_11 = arith.constant 0.000000e+00 : f32
    %15 = vector.broadcast %cst_11 : f32 to vector<16x128xf32>
    %16 = arith.maximumf %14, %15 : vector<16x128xf32>
    %17 = arith.truncf %16 : vector<16x128xf32> to vector<16x128xbf16>
    %c0_12 = arith.constant 0 : index
    %c0_13 = arith.constant 0 : index
    %18 = vector.load %arg6[%c0_12, %c0_13] : memref<128x2xbf16, #tpu.memory_space<vmem>>, vector<128x2xbf16>
    %cst_14 = arith.constant dense<0.000000e+00> : vector<16x2xf32>
    %19 = tpu.matmul %17, %18, %cst_14 {dimension_numbers = #tpu.dot_dimension_numbers<[1], [0], [0], [1], [0, 0, 1, 1], [], []>} : vector<16x128xbf16>, vector<128x2xbf16>, vector<16x2xf32> -> vector<16x2xf32>
    %c0_15 = arith.constant 0 : index
    %c0_16 = arith.constant 0 : index
    %20 = vector.load %arg7[%c0_15, %c0_16] : memref<1x2xf32, #tpu.memory_space<vmem>>, vector<1x2xf32>
    %21 = vector.broadcast %20 : vector<1x2xf32> to vector<16x2xf32>
    %22 = arith.addf %19, %21 : vector<16x2xf32>
    %c0_17 = arith.constant 0 : index
    %c0_18 = arith.constant 0 : index
    %23 = vector.load %arg8[%c0_17, %c0_18] : memref<16x2xf32, #tpu.memory_space<vmem>>, vector<16x2xf32>
    tpu.vector_store %arg8[%c0_17, %c0_18], %22 {strides = array<i32>} : memref<16x2xf32, #tpu.memory_space<vmem>>, vector<16x2xf32>,
    return
  }
  func.func @transform_0(%arg0: i32) -> (i32, i32) {
    %c0_i32 = arith.constant 0 : i32
    %c0_i32_0 = arith.constant 0 : i32
    return %arg0, %c0_i32 : i32, i32
  }
  func.func @transform_1(%arg0: i32) -> (i32, i32) {
    %c0_i32 = arith.constant 0 : i32
    %c0_i32_0 = arith.constant 0 : i32
    %c0_i32_1 = arith.constant 0 : i32
    return %c0_i32, %c0_i32_0 : i32, i32
  }
  func.func @transform_2(%arg0: i32) -> (i32, i32) {
    %c0_i32 = arith.constant 0 : i32
    %c0_i32_0 = arith.constant 0 : i32
    %c0_i32_1 = arith.constant 0 : i32
    return %c0_i32, %c0_i32_0 : i32, i32
  }
  func.func @transform_3(%arg0: i32) -> (i32, i32) {
    %c0_i32 = arith.constant 0 : i32
    %c0_i32_0 = arith.constant 0 : i32
    %c0_i32_1 = arith.constant 0 : i32
    return %c0_i32, %c0_i32_0 : i32, i32
  }
  func.func @transform_4(%arg0: i32) -> (i32, i32) {
    %c0_i32 = arith.constant 0 : i32
    %c0_i32_0 = arith.constant 0 : i32
    %c0_i32_1 = arith.constant 0 : i32
    return %c0_i32, %c0_i32_0 : i32, i32
  }
  func.func @transform_5(%arg0: i32) -> (i32, i32) {
    %c0_i32 = arith.constant 0 : i32
    %c0_i32_0 = arith.constant 0 : i32
    %c0_i32_1 = arith.constant 0 : i32
    return %c0_i32, %c0_i32_0 : i32, i32
  }
  func.func @transform_6(%arg0: i32) -> (i32, i32) {
    %c0_i32 = arith.constant 0 : i32
    %c0_i32_0 = arith.constant 0 : i32
    %c0_i32_1 = arith.constant 0 : i32
    return %c0_i32, %c0_i32_0 : i32, i32
  }
  func.func @transform_7(%arg0: i32) -> (i32, i32) {
    %c0_i32 = arith.constant 0 : i32
    %c0_i32_0 = arith.constant 0 : i32
    return %arg0, %c0_i32 : i32, i32
  }
}

</mosaic_0001>

<bundles_post_ra>
// kernel: mlp_estimator_forward.1
= control target key start
LH: loop header
LB: loop body
LE: loop exit
PB: predicated region body
PF: predicated region fallthrough
CT: control target
= control target key end

     0   :  { %12 = vsyncpa [#allocation3], 0  ;;  %v486_v1 = vmov 0.0   ;;  %vm54_vm0 = vcmask 1043456   ;;  %vm487_vm1 = vmmov 0   ;;  %vm50_vm2 = vcmask 195584   ;;  %s633_s0 = inlined_call_operand.vmem [shape: f32[2,24], index: 0, kind: input, shape index: {}]   ;;  %s634_s1 = inlined_call_operand.vmem [shape: bf16[24,128], index: 1, kind: input, shape index: {}]   ;;  %s635_s2 = inlined_call_operand.vmem [shape: f32[1,128], index: 2, kind: input, shape index: {}]   ;;  %s636_s3 = inlined_call_operand.vmem [shape: bf16[128,128], index: 3, kind: input, shape index: {}]   ;;  %s637_s4 = inlined_call_operand.vmem [shape: f32[1,128], index: 4, kind: input, shape index: {}]   ;;  %s638_s5 = inlined_call_operand.vmem [shape: bf16[128,2], index: 5, kind: input, shape index: {}]   ;;  %s639_s6 = inlined_call_operand.vmem [shape: f32[1,2], index: 6, kind: input, shape index: {}]   ;;  %s640_s7 = inlined_call_operand.hbm [shape: f32[2,2], index: 7, kind: output, shape index: {}]  }
   0x1   :  { %v444_v0 = vld [vmem:[%s634_s1] sm:$0xff]   ;;  %391 = vmatprep.subr.bf16.mxu0 %v486_v1  ;;  %v445_v2 = vld [vmem:[%s634_s1 + $0x8] ss:$0 sps:$4 sm:$0xff]   ;;  %399 = vmatprep.subr.bf16.mxu1 %v486_v1  ;;  %v448_v9 = vld [vmem:[%s636_s3 + $0x10] sm:$0xff]   ;;  %vm329_vm3 = vcmask 15360  }
   0x2   :  { %392 = vmatpush3.bf16.msra.mxu0 %v444_v0  ;;  %v28_v3 = vld [vmem:[%s633_s0] sm:$0xff]  ;;  %v29_v4 = vld [vmem:[%s633_s0 + $0x8] sm:$0xff]  ;;  %v56_v6 = vsel %vm54_vm0, %v445_v2, 0  ;;  %395 = vmatprep.mubr.msk.bf16.mxu0 %vm487_vm1, %v486_v1  ;;  %v449_v10 = vld [vmem:[%s636_s3 + $0x18] sm:$0xff]  }
   0x3   :  { %v446_v5 = vld [vmem:[%s636_s3] sm:$0xff]   ;;  %393 = vmatprep.subr.bf16.mxu0 %v486_v1  ;;  %v447_v7 = vld [vmem:[%s636_s3 + $0x8] sm:$0xff]   ;;  %415 = vmatprep.mubr.msk.bf16.mxu1 %vm487_vm1, %v486_v1  ;;  %v30_v8 = vpack.c.bf16 %v29_v4, %v28_v3  ;;  %v452_v13 = vld [vmem:[%s636_s3 + $0x30] sm:$0xff]  }
   0x4   :  { %400 = vmatpush3.bf16.msra.mxu1 %v446_v5  ;;  %v450_v11 = vld [vmem:[%s636_s3 + $0x20] sm:$0xff]   ;;  %v451_v12 = vld [vmem:[%s636_s3 + $0x28] sm:$0xff]   ;;  %v453_v14 = vld [vmem:[%s636_s3 + $0x38] sm:$0xff]  }
   0x5   :  { %401 = vmatprep.subr.bf16.mxu1 %v486_v1  ;;  %v454_v15 = vld [vmem:[%s638_s5] sm:$0xff]   ;;  %v455_v16 = vld [vmem:[%s638_s5 + $0x8] sm:$0xff]   ;;  %v456_v17 = vld [vmem:[%s638_s5 + $0x10] sm:$0xff]  }
   0x6   :  { %394 = vmatpush3.bf16.msra.mxu0 %v56_v6  ;;  %v457_v18 = vld [vmem:[%s638_s5 + $0x18] sm:$0xff]   ;;  %v458_v19 = vld [vmem:[%s638_s5 + $0x20] sm:$0xff]   ;;  %v459_v20 = vld [vmem:[%s638_s5 + $0x28] sm:$0xff]  }
   0x7   :  { %419 = vmatprep.subr.bf16.mxu0 %v486_v1  ;;  %v348_v21 = vld [vmem:[%s635_s2] ss:$0 sm:$0xff]  ;;  %v460_v31 = vld [vmem:[%s638_s5 + $0x30] sm:$0xff]   ;;  %v461_v32 = vld [vmem:[%s638_s5 + $0x38] sm:$0xff]  }
   0x8   :  { %402 = vmatpush3.bf16.msra.mxu1 %v447_v7  ;;  %v352_v33 = vld [vmem:[%s637_s4] ss:$0 sm:$0xff] }
   0x9   :  { %396 = vmatmul.mubr.msk.bf16.vlgmr.msra.gmra.mrb[0].mxu0 %vm50_vm2, %v30_v8  ;;  %403 = vmatprep.subr.bf16.mxu1 %v486_v1  ;;  %v361_v43 = vld [vmem:[%s639_s6] ss:$0 sm:$0xff] }
   0xa   :  { %435 = vmatprep.mubr.msk.bf16.mxu0 %vm487_vm1, %v486_v1  ;;  %420 = vmatpush3.bf16.msra.mxu0 %v454_v15 }
   0xb   :  { %421 = vmatprep.subr.bf16.mxu0 %v486_v1 }
   0xc   :  { %404 = vmatpush3.bf16.msra.mxu1 %v448_v9 }
   0xd   :  { %405 = vmatprep.subr.bf16.mxu1 %v486_v1 }
   0xe   :  { %422 = vmatpush3.bf16.msra.mxu0 %v455_v16 }
   0xf   :  { %423 = vmatprep.subr.bf16.mxu0 %v486_v1 }
  0x10   :  { %406 = vmatpush3.bf16.msra.mxu1 %v449_v10 }
  0x11   :  { %407 = vmatprep.subr.bf16.mxu1 %v486_v1 }
  0x12   :  { %424 = vmatpush3.bf16.msra.mxu0 %v456_v17 }
  0x13   :  { %425 = vmatprep.subr.bf16.mxu0 %v486_v1 }
  0x14   :  { %408 = vmatpush3.bf16.msra.mxu1 %v450_v11 }
  0x15   :  { %409 = vmatprep.subr.bf16.mxu1 %v486_v1 }
  0x16   :  { %426 = vmatpush3.bf16.msra.mxu0 %v457_v18 }
  0x17   :  { %427 = vmatprep.subr.bf16.mxu0 %v486_v1 }
  0x18   :  { %410 = vmatpush3.bf16.msra.mxu1 %v451_v12 }
  0x19   :  { %411 = vmatprep.subr.bf16.mxu1 %v486_v1 }
  0x1a   :  { %428 = vmatpush3.bf16.msra.mxu0 %v458_v19 }
  0x1b   :  { %429 = vmatprep.subr.bf16.mxu0 %v486_v1 }
  0x1c   :  { %412 = vmatpush3.bf16.msra.mxu1 %v452_v13 }
  0x1d   :  { %413 = vmatprep.subr.bf16.mxu1 %v486_v1 }
  0x1e   :  { %430 = vmatpush3.bf16.msra.mxu0 %v459_v20 }
  0x1f   :  { %431 = vmatprep.subr.bf16.mxu0 %v486_v1 }
  0x20   :  { %414 = vmatpush3.bf16.msra.mxu1 %v453_v14 }
  0x22   :  { %432 = vmatpush3.bf16.msra.mxu0 %v460_v31 }
  0x23   :  { %433 = vmatprep.subr.bf16.mxu0 %v486_v1 }
  0x26   :  { %434 = vmatpush3.bf16.msra.mxu0 %v461_v32 }
  0xdc   :  { %v92_v22 = vpop.f32.mrb[0].mxu0 }
  0xdd   :  { %v93_v23 = vadd.f32 %v348_v21, %v92_v22  ;;  %v397_v24 = vpop.f32.mrb[1].mxu0 }
  0xde   :  { %v95_v25 = vpop.f32.mrb[2].mxu0 }
  0xdf   :  { %v96_v26 = vadd.f32 %v348_v21, %v95_v25  ;;  %v398_v27 = vpop.f32.mrb[3].mxu0  ;;  %v99_v28 = vmax.f32 %v93_v23, 0.0 }
  0xe1   :  { %v100_v29 = vmax.f32 %v96_v26, 0.0 }
  0xe3   :  { %v101_v30 = vpack.c.bf16 %v100_v29, %v99_v28 }
  0xe5   :  { %416 = vmatmul.mubr.bf16.vlgmr.msra.gmra.mrb[0].mxu1 %v101_v30 }
 0x1b8   :  { %v207_v34 = vpop.f32.mrb[0].mxu1 }
 0x1b9   :  { %v208_v35 = vadd.f32 %v352_v33, %v207_v34  ;;  %v417_v36 = vpop.f32.mrb[1].mxu1 }
 0x1ba   :  { %v210_v37 = vpop.f32.mrb[2].mxu1 }
 0x1bb   :  { %v211_v38 = vadd.f32 %v352_v33, %v210_v37  ;;  %v418_v39 = vpop.f32.mrb[3].mxu1  ;;  %v214_v40 = vmax.f32 %v208_v35, 0.0 }
 0x1bd   :  { %v215_v41 = vmax.f32 %v211_v38, 0.0 }
 0x1bf   :  { %v216_v42 = vpack.c.bf16 %v215_v41, %v214_v40 }
 0x1c1   :  { %436 = vmatmul.mubr.bf16.vlgmr.msra.gmra.mrb[4].mxu0 %v216_v42 }
 0x294   :  { %v322_v44 = vpop.f32.mrb[4].mxu0 }
 0x295   :  { %v323_v45 = vadd.f32 %v361_v43, %v322_v44  ;;  %v437_v46 = vpop.f32.mrb[5].mxu0 }
 0x296   :  { %v325_v47 = vpop.f32.mrb[6].mxu0 }
 0x297   :  { %330 = vst.msk [vmem:[#allocation2] sm:$0xff] %vm329_vm3, %v323_v45  ;;  %v326_v48 = vadd.f32 %v361_v43, %v325_v47  ;;  %v438_v49 = vpop.f32.mrb[7].mxu0 }
 0x299   :  { %331 = vst.msk [vmem:[#allocation2 + $0x8] sm:$0xff] %vm329_vm3, %v326_v48 }
 0x29a   :  { %336 = vsyncadd [#allocation3], 224  ;;  %s488_s4 = smov [#allocation2]  }
 0x29b   :  { %s337_s5 = sshll.u32 %s488_s4, 4  ;;  %s338_s5 = int_to_ptr.vmem [resolvable:$true] %s337_s5 }
 0x29c   :  { %s462_s18 = scalar_lea.vmem %s338_s5, 32  ;;  %s466_s19 = scalar_lea.vmem %s338_s5, 256 }
 0x29d   :  { %p463_p0 = scmp.ne.s32.totalorder %s338_s5, %s462_s18  ;;  %p467_p1 = scmp.lt.s32.totalorder %s338_s5, %s338_s5 }
 0x29e   :  { %p468_p2 = scmp.lt.s32.totalorder %s466_s19, %s462_s18 }
 0x2a0   :  { %p469_p3 = por %p468_p2, %p467_p1 }
 0x2a2   :  { %p470_p4 = pnand %p469_p3, %p463_p0 }
 0x2a4   :  { %473 = shalt.err (!%p470_p4)
}
 0x2a5   :  { %s474_s21 = scalar_lea.hbm %s640_s7, 32 }
 0x2a6   :  { %p475_p5 = scmp.ne.s32.totalorder %s640_s7, %s474_s21  ;;  %p478_p6 = scmp.lt.u32.totalorder %s474_s21, %s640_s7 }
 0x2a8   :  { %p480_p7 = pnand %p478_p6, %p475_p5 }
 0x2aa   :  { %483 = shalt.err (!%p480_p7)
}
 0x2ab   :  { %s489_s26 = smov 32   ;;  %s490_s27 = smov 2  }
 0x2ac   :  { %343 = dma.vmem_to_hbm [thread:$0]  %s338_s5, 32, %s640_s7, [#allocation3], %s489_s26, %s489_s26, %s490_s27  }
 0x2ad   :  { %484 = dma.done.wait [#allocation3], 256  }
 0x2ae   :  { %485 = vsyncadd [#allocation3], 4294967040 }
 0x2af   :  { %347 = vsyncpa [#allocation3], 1 }

</bundles_post_ra>
